<compile_context>
chip_gen: v5e
topology: v5e:2x2
jax: 0.10.0
libtpu: 0.0.40
codegen_flags: <defaults>
</compile_context>

<pallas_src>
from functools import partial

import jax
import jax.numpy as jnp
from jax.experimental import pallas as pl
from jax.experimental.pallas import tpu as pltpu

_LANE = 128  # TPU lane width; batch tiles must be multiples of this.


def _round_up(n: int, m: int) -> int:
    return (n + m - 1) // m * m


def _match_kernel(params_ref, xT_ref, oT_ref):
    """One batch tile of out.T = W @ x.T + b.

    params_ref: SMEM [6] f32 = [w00, w01, w10, w11, b0, b1]
                (PyTorch weight layout [out_features, in_features], row-major)
    xT_ref:     VMEM [2, TB] (features on sublanes, batch on lanes)
    oT_ref:     VMEM [2, TB]
    """
    # Feature rows, upcast to f32 so the FMAs stay on the 4-wide f32 VALUs
    # (v5e has no bf16 VPU path).
    x0 = xT_ref[0:1, :].astype(jnp.float32)   # [1, TB]
    x1 = xT_ref[1:2, :].astype(jnp.float32)   # [1, TB]

    # Six scalars straight from SMEM; W.T is folded into the indexing.
    w00 = params_ref[0]
    w01 = params_ref[1]
    w10 = params_ref[2]
    w11 = params_ref[3]
    b0 = params_ref[4]
    b1 = params_ref[5]

    # Two broadcasted FMAs per output row — pure VPU work, no MXU.
    oT_ref[0:1, :] = (w00 * x0 + w01 * x1 + b0).astype(oT_ref.dtype)
    oT_ref[1:2, :] = (w10 * x0 + w11 * x1 + b1).astype(oT_ref.dtype)


@partial(jax.jit, static_argnames=("block_b",))
def match_network_forward(x, weight, bias, *, block_b=1024):
    """Pallas implementation of MatchNetwork.forward (= nn.Linear(2, 2)).

    Args:
      x:       [B, 2] float32
      weight:  [2, 2] float32, PyTorch layout (out_features, in_features)
      bias:    [2]    float32
      block_b: lane-axis batch tile (rounded up to a multiple of 128)
    Returns:
      [B, 2] float32 = x @ weight.T + bias
    """
    B, in_f = x.shape
    out_f = weight.shape[0]
    assert in_f == 2 and out_f == 2, "MatchNetwork is a fixed Linear(2, 2)"

    # Lane tile: multiple of 128, no larger than the padded batch.
    tile = _round_up(min(block_b, _round_up(B, _LANE)), _LANE)
    Bp = _round_up(B, tile)

    # Layout plumbing (inside jit): batch onto lanes, pad the ragged tail.
    xT = x.T                                   # [2, B]
    if Bp != B:
        xT = jnp.pad(xT, ((0, 0), (0, Bp - B)))

    # Six parameters flattened into one 1-D SMEM array (no 2-D SMEM padding).
    params = jnp.concatenate(
        [weight.reshape(-1), bias.reshape(-1)]).astype(jnp.float32)

    grid = (Bp // tile,)

    out_T = pl.pallas_call(
        _match_kernel,
        out_shape=jax.ShapeDtypeStruct((2, Bp), x.dtype),
        grid=grid,
        in_specs=[
            # Parameters: 6 scalars in SMEM, read with scalar loads.
            pl.BlockSpec(memory_space=pltpu.MemorySpace.SMEM),
            # x.T streamed as lane-dense [2, tile] blocks over the batch.
            pl.BlockSpec((2, tile), lambda i: (0, i)),
        ],
        out_specs=pl.BlockSpec((2, tile), lambda i: (0, i)),
        compiler_params=pltpu.CompilerParams(
            dimension_semantics=("parallel",),  # shards batch across TCs on v7x
        ),
    )(params, xT)

    # Undo the padding / transpose back to PyTorch's [B, 2] layout.
    return out_T[:, :B].T


def init_match_network_params(key):
    """Deterministic init mimicking nn.Linear(2, 2): U(-1/sqrt(in), 1/sqrt(in))."""
    in_f, out_f = 2, 2
    k_w, k_b = jax.random.split(key)
    bound = 1.0 / jnp.sqrt(in_f)
    weight = jax.random.uniform(k_w, (out_f, in_f), jnp.float32, -bound, bound)
    bias = jax.random.uniform(k_b, (out_f,), jnp.float32, -bound, bound)
    return weight, bias


if __name__ == "__main__":
    key = jax.random.PRNGKey(0)
    k_params, k_x = jax.random.split(key)

    weight, bias = init_match_network_params(k_params)

    # Non-multiple-of-128 batch exercises the pad/slice path.
    B = 300
    x = jax.random.normal(k_x, (B, 2), jnp.float32)
    ref = x @ weight.T + bias

    # Multi-tile path: block_b=128 -> 3 grid steps.
    out_multi = jax.block_until_ready(
        match_network_forward(x, weight, bias, block_b=128))
    assert out_multi.shape == (B, 2)
    assert jnp.allclose(out_multi, ref, atol=1e-5, rtol=1e-5)

    # Single-tile path (default block_b covers the whole padded batch).
    out_single = jax.block_until_ready(match_network_forward(x, weight, bias))
    assert out_single.shape == (B, 2)
    assert jnp.allclose(out_single, ref, atol=1e-5, rtol=1e-5)

    print("KERNEL_OK")
</pallas_src>

<mosaic_0001>
module attributes {stable_mosaic.version = 11 : i64} {
  func.func @_match_kernel(%arg0: i32, %arg1: memref<6xf32, #tpu.memory_space<smem>>, %arg2: memref<2x128xf32, #tpu.memory_space<vmem>>, %arg3: memref<2x128xf32, #tpu.memory_space<vmem>>) attributes {dimension_semantics = [#tpu.dimension_semantics<parallel>], iteration_bounds = array<i64: 3>, scalar_prefetch = 0 : i64, scratch_operands = 0 : i64, tpu.core_type = #tpu.core_type<tc>, window_params = [{transform_indices = @transform_0, window_bounds = array<i64: 6>}, {transform_indices = @transform_1, window_bounds = array<i64: 2, 128>}, {transform_indices = @transform_2, window_bounds = array<i64: 2, 128>}]} {
    %c0 = arith.constant 0 : index
    %c0_0 = arith.constant 0 : index
    %0 = vector.load %arg2[%c0, %c0_0] : memref<2x128xf32, #tpu.memory_space<vmem>>, vector<1x128xf32>
    %c1 = arith.constant 1 : index
    %c0_1 = arith.constant 0 : index
    %1 = vector.load %arg2[%c1, %c0_1] : memref<2x128xf32, #tpu.memory_space<vmem>>, vector<1x128xf32>
    %c0_2 = arith.constant 0 : index
    %2 = memref.load %arg1[%c0_2] : memref<6xf32, #tpu.memory_space<smem>>
    %c1_3 = arith.constant 1 : index
    %3 = memref.load %arg1[%c1_3] : memref<6xf32, #tpu.memory_space<smem>>
    %c2 = arith.constant 2 : index
    %4 = memref.load %arg1[%c2] : memref<6xf32, #tpu.memory_space<smem>>
    %c3 = arith.constant 3 : index
    %5 = memref.load %arg1[%c3] : memref<6xf32, #tpu.memory_space<smem>>
    %c4 = arith.constant 4 : index
    %6 = memref.load %arg1[%c4] : memref<6xf32, #tpu.memory_space<smem>>
    %c5 = arith.constant 5 : index
    %7 = memref.load %arg1[%c5] : memref<6xf32, #tpu.memory_space<smem>>
    %8 = vector.broadcast %2 : f32 to vector<1x128xf32>
    %9 = arith.mulf %8, %0 : vector<1x128xf32>
    %10 = vector.broadcast %3 : f32 to vector<1x128xf32>
    %11 = arith.mulf %10, %1 : vector<1x128xf32>
    %12 = arith.addf %9, %11 : vector<1x128xf32>
    %13 = vector.broadcast %6 : f32 to vector<1x128xf32>
    %14 = arith.addf %12, %13 : vector<1x128xf32>
    %c0_4 = arith.constant 0 : index
    %c0_5 = arith.constant 0 : index
    %15 = vector.load %arg3[%c0_4, %c0_5] : memref<2x128xf32, #tpu.memory_space<vmem>>, vector<1x128xf32>
    tpu.vector_store %arg3[%c0_4, %c0_5], %14 {strides = array<i32>} : memref<2x128xf32, #tpu.memory_space<vmem>>, vector<1x128xf32>,
    %16 = vector.broadcast %4 : f32 to vector<1x128xf32>
    %17 = arith.mulf %16, %0 : vector<1x128xf32>
    %18 = vector.broadcast %5 : f32 to vector<1x128xf32>
    %19 = arith.mulf %18, %1 : vector<1x128xf32>
    %20 = arith.addf %17, %19 : vector<1x128xf32>
    %21 = vector.broadcast %7 : f32 to vector<1x128xf32>
    %22 = arith.addf %20, %21 : vector<1x128xf32>
    %c1_6 = arith.constant 1 : index
    %c0_7 = arith.constant 0 : index
    %23 = vector.load %arg3[%c1_6, %c0_7] : memref<2x128xf32, #tpu.memory_space<vmem>>, vector<1x128xf32>
    tpu.vector_store %arg3[%c1_6, %c0_7], %22 {strides = array<i32>} : memref<2x128xf32, #tpu.memory_space<vmem>>, vector<1x128xf32>,
    return
  }
  func.func @transform_0(%arg0: i32) -> i32 {
    %c0_i32 = arith.constant 0 : i32
    %c0_i32_0 = arith.constant 0 : i32
    return %c0_i32 : i32
  }
  func.func @transform_1(%arg0: i32) -> (i32, i32) {
    %c0_i32 = arith.constant 0 : i32
    %c0_i32_0 = arith.constant 0 : i32
    return %c0_i32, %arg0 : i32, i32
  }
  func.func @transform_2(%arg0: i32) -> (i32, i32) {
    %c0_i32 = arith.constant 0 : i32
    %c0_i32_0 = arith.constant 0 : i32
    return %c0_i32, %arg0 : i32, i32
  }
}

</mosaic_0001>

<bundles_post_ra>
// kernel: match_network_forward.1
= control target key start
LH: loop header
LB: loop body
LE: loop exit
PB: predicated region body
PF: predicated region fallthrough
CT: control target
= control target key end

     0   :  { %7 = vsyncpa [#allocation3], 0  ;;  %s320_s9 = smov 0   ;;  %s340_s0 = inlined_call_operand.vmem [shape: f32[6], index: 0, kind: input, shape index: {}]   ;;  %s341_s1 = inlined_call_operand.vmem [shape: f32[2,384], index: 1, kind: input, shape index: {}]   ;;  %s342_s2 = inlined_call_operand.vmem [shape: f32[2,384], index: 2, kind: output, shape index: {}]  }
   0x1 LB: > { %s242_s10 = sadd.s32 4294967295, %s302_s9   ;;  %p244_p0 = scmp.ge.s32.totalorder %s302_s9, 1  ;;  %s302_s9 = sphi %s320_s9, %s13_s9  }
   0x2   : > { %p91_p1 = scmp.lt.s32.totalorder %s302_s9, 4  ;;  %s103_s13 = sshll.u32 %s340_s0, 4  ;;  %s104_s13 = int_to_ptr.vmem [resolvable:$true] %s103_s13 }
   0x3   : > { %p266_p3 = scmp.eq.s32.totalorder %s242_s10, 0  ;;  %s304_s14 = smov [#allocation2]  }
   0x4   : > { %p92_p2 = pnand %p244_p0, %p91_p1 }
   0x6   : > { %p262_p4 = pneg %p92_p2  ;;  %123 = sbr.rel (%p92_p2) target bundleno = 31 (0x1f), region = 28 }
   0x8   : > { %p263_p5 = pnand %p266_p3, %p262_p4 }
   0xa   : > { %265 = dma.vmem_to_smem (!%p263_p5), %s104_s13, 16, %s304_s14, [#allocation3]  }
   0xb   : > { %297 = dma.done.wait (%p266_p3), [#allocation3], 16  }
   0xc   : > { %299 = vsyncadd (%p266_p3), [#allocation3], 4294967280 }
   0xd   : > { %130 = sfence }
   0xe   : > { %p145_p6 = scmp.lt.s32.totalorder %s242_s10, 2  ;;  %s155_s15 = sld [smem:[#allocation2]] }
   0xf   : > { %s251_s16 = sld [smem:[#allocation2 + $0x1]] }
  0x10   : > { %s344_s10 = smov (!%p145_p6, %s242_s10), 2  ;;  %s252_s17 = sld [smem:[#allocation2 + $0x2]] }
  0x11   : > { %s249_s18 = sshll.u32 %s344_s10, 1  ;;  %s253_s19 = sld [smem:[#allocation2 + $0x3]] }
  0x12   : > { %s148_s22 = scalar_lea.vmem %s341_s1, %s249_s18  ;;  %s254_s23 = sld [smem:[#allocation2 + $0x4]] }
  0x13   : > { %v153_v0 = vld [vmem:[%s148_s22] sm:$0x1]  ;;  %v154_v1 = vld [vmem:[%s148_s22 + $0x1] sm:$0x1]  ;;  %s255_s24 = sld [smem:[#allocation2 + $0x5]]  ;;  %s152_s27 = scalar_lea.vmem %s342_s2, %s249_s18 }
  0x14   : > { %v161_v2 = vstv %s155_s15 }
  0x15   : > { %v162_v3 = vmul.f32 %v161_v2, %v153_v0  ;;  %v163_v4 = vstv %s251_s16 }
  0x16   : > { %v164_v5 = vmul.f32 %v163_v4, %v154_v1  ;;  %v169_v6 = vstv %s252_s17 }
  0x17   : > { %v170_v8 = vmul.f32 %v169_v6, %v153_v0  ;;  %v171_v9 = vstv %s253_s19 }
  0x18   : > { %v165_v7 = vadd.f32 %v164_v5, %v162_v3  ;;  %v172_v10 = vmul.f32 %v171_v9, %v154_v1  ;;  %v166_v11 = vstv %s254_s23 }
  0x19   : > { %v174_v14 = vstv %s255_s24 }
  0x1a   : > { %v167_v12 = vadd.f32 %v166_v11, %v165_v7  ;;  %v173_v13 = vadd.f32 %v172_v10, %v170_v8 }
  0x1c   : > { %168 = vst [vmem:[%s152_s27] sm:$0x1] %v167_v12  ;;  %v175_v15 = vadd.f32 %v174_v14, %v173_v13 }
  0x1e   : > { %176 = vst [vmem:[%s152_s27 + $0x1] sm:$0x1] %v175_v15 }
  0x1f PF: > { %s13_s9 = sadd.s32 1, %s302_s9  }
  0x20   : > { %p10_p7 = scmp.ge.s32.totalorder %s13_s9, 5  }
  0x22   :  { %12 = sbr.rel (!%p10_p7) target bundleno = 1 (0x1), region = 63 }
  0x27   :  { %196 = vsyncpa [#allocation3], 1 }
  0x28   :  { %198 = vsyncpa [#allocation3 + $0x1], 1 }

</bundles_post_ra>
